<compile_context>
chip_gen: v7x
topology: tpu7x:2x2x1
jax: 0.10.0
libtpu: 0.0.40
codegen_flags: <defaults>
</compile_context>

<pallas_src>
from functools import partial

import jax
import jax.numpy as jnp
from jax import lax
from jax.experimental import pallas as pl
from jax.experimental.pallas import tpu as pltpu

# ---------------------------------------------------------------------------
# Synthetic hyper-parameters (mirror the Namespace fields read by the module)
# ---------------------------------------------------------------------------
SEM_UPSAMPLE_BASE = 32          # hp.Semantic_F0_Predictor.Upsample.Base_Size
SEM_UPSAMPLE_RATE = [2, 2]      # hp.Semantic_F0_Predictor.Upsample.Rate
DEC_UPSAMPLE_BASE = 32          # hp.Decoder.Upsample.Base_Size
KERNEL_SIZES = [3, 3]           # hp.Decoder.F0_Prenet.Kernel_Size (odd only)
DILATIONS = [1, 3]              # hp.Decoder.F0_Prenet.Dilation_Size
LEAKY_SLOPE = 0.1               # hp.Decoder.LeakyRelu_Negative_Slope
F0_HOP = 160                    # hp.Sound.F0_Hop_Size
HOP = 80                        # hp.Sound.Hop_Size

C_IN = SEM_UPSAMPLE_BASE // (2 ** len(SEM_UPSAMPLE_RATE))   # 8
C_OUT = DEC_UPSAMPLE_BASE                                   # 32
assert F0_HOP % HOP == 0, "non-integer interpolate scale not supported"
SCALE = F0_HOP // HOP                                       # 2 (nearest upsample)

HALO = 128                      # lane-aligned halo block read from each neighbour
REACHES = [d * ((k - 1) // 2) for k, d in zip(KERNEL_SIZES, DILATIONS)]   # [1, 3]
assert sum(REACHES) <= HALO


# ---------------------------------------------------------------------------
# Pallas kernel: one (batch, time-tile) grid step, channel-major
# ---------------------------------------------------------------------------
def f0_prenet_kernel(xl_ref, xc_ref, xr_ref,
                     wr_ref, br_ref, w0_ref, b0_ref, w1_ref, b1_ref,
                     o_ref, *, t_up):
    """xl/xr: (1, C_in, 128) halo blocks; xc: (1, C_in, TILE) centre tile of the
    zero-padded, x2-upsampled input (time on the lane axis).  w0/w1: per-tap
    (K, C_out, C_in) weights, wr: (C_out, C_in), b*: (C_out, 1).
    o: (1, C_out, TILE) written lane-dense, already NCL."""
    tile = o_ref.shape[2]
    halo = xl_ref.shape[2]               # 128

    xl = xl_ref[0]                       # (C_in, 128)
    xc = xc_ref[0]                       # (C_in, tile)
    xr = xr_ref[0]                       # (C_in, 128)

    # Residual path: 1x1 conv on the raw (pre-activation) upsampled centre tile
    # (no dependency on the halo concat).
    res = jnp.dot(wr_ref[...], xc, preferred_element_type=jnp.float32) + br_ref[...]

    # Halo-extended window: tile-relative positions [-halo, tile + halo).
    # All three pieces are 128-lane aligned, so the concat is layout-cheap.
    ext = jnp.concatenate([xl, xc, xr], axis=1)

    # Conv stack.  Stage i produces tile-relative positions [-need, tile+need)
    # where `need` is the halo still required by the remaining stages, so the
    # last stage lands exactly on the output tile.  Each stage is K per-tap
    # [C_out, C] @ [C, width] MXU dots accumulated in f32 (no sublane-stacked
    # RHS buffer).
    need_after = [sum(REACHES[i + 1:]) for i in range(len(REACHES))]
    stages = ((w0_ref, b0_ref, KERNEL_SIZES[0], DILATIONS[0]),
              (w1_ref, b1_ref, KERNEL_SIZES[1], DILATIONS[1]))

    base = pl.program_id(1) * tile       # global position of this tile's col 0
    cur = ext
    lo = -halo                           # tile-relative position of cur[:, 0]
    for i, ((w_ref, b_ref, ksz, dil), need) in enumerate(zip(stages, need_after)):
        a = jnp.where(cur >= 0, cur, LEAKY_SLOPE * cur)          # LeakyReLU
        if i > 0:
            # PyTorch zero-pads each conv's (activated) input at the *global*
            # sequence boundary; re-impose that here.  Stage 0 does not need
            # it because the padded input is zero outside [0, T_up) and
            # LeakyReLU(0) == 0.  Row mask (1, width) -> one broadcast select.
            pos = base + lo + lax.broadcasted_iota(jnp.int32, (1, a.shape[1]), 1)
            ok = (pos >= 0) & (pos < t_up)
            a = jnp.where(ok, a, 0.0)

        width = tile + 2 * need
        center = (ksz - 1) // 2          # matches PyTorch padding (odd k only)
        acc = None
        for j in range(ksz):             # static unroll; all offsets are ints
            off = (j - center) * dil
            start = (-need + off) - lo
            tap = a[:, start:start + width]
            d = jnp.dot(w_ref[j], tap, preferred_element_type=jnp.float32)
            acc = d if acc is None else acc + d
        cur = acc + b_ref[...]
        lo = -need

    o_ref[0] = (cur + res).astype(o_ref.dtype)


# ---------------------------------------------------------------------------
# Wrapper: glue layout prep + pallas_call
# ---------------------------------------------------------------------------
def _pick_tile(t_up: int, batch: int) -> int:
    """Time-tile (lane) width: multiple of 128, large enough to amortize the
    per-grid-step overhead, but keeping batch * n_tiles >= 2 when possible so
    v7x's two TensorCores both get work."""
    cap = 4096
    t_al = max(128, -(-t_up // 128) * 128)
    tile = min(cap, t_al)
    if batch * (-(-t_up // tile)) < 2 and tile >= 256:
        tile = -(-(tile // 2) // 128) * 128
    return tile


def f0_prenet_pallas(x_nct, params):
    """x_nct: [B, C_in, T] float32 (PyTorch NCL).  Returns [B, C_out, T*SCALE]."""
    (wr, br), (w0, b0), (w1, b1) = params
    B, c_in, T = x_nct.shape
    assert c_in == C_IN
    T_up = T * SCALE
    tile = _pick_tile(T_up, B)
    nt = -(-T_up // tile)                  # number of time tiles
    t_grid = nt * tile
    r = tile // HALO                       # halo-block units per time tile

    # Nearest x2 upsample + zero pad (one fused XLA producer over the small
    # 8-channel tensor).  Left pad is one full tile so centre blocks stay
    # block-aligned; the kernel only reads 128-wide halo blocks on each side,
    # not whole neighbour tiles.
    x_up = jnp.repeat(x_nct, SCALE, axis=-1)                   # [B, C_in, T_up]
    x_pad = jnp.pad(x_up, ((0, 0), (0, 0), (tile, tile + (t_grid - T_up))))

    # Per-tap weight layouts: (K, C_out, C_in); residual 1x1 as (C_out, C_in).
    wr_k = wr[:, :, 0]                                   # (32, 8)
    w0_t = jnp.transpose(w0, (2, 0, 1))                  # (K0, 32, 8)
    w1_t = jnp.transpose(w1, (2, 0, 1))                  # (K1, 32, 32)
    br_k = br.reshape(C_OUT, 1)
    b0_k = b0.reshape(C_OUT, 1)
    b1_k = b1.reshape(C_OUT, 1)

    flops = 2 * B * t_grid * C_OUT * (
        C_IN + KERNEL_SIZES[0] * C_IN + KERNEL_SIZES[1] * C_OUT)
    bytes_accessed = 4 * B * (C_IN * (t_grid + 2 * HALO * nt) + C_OUT * t_grid)

    out = pl.pallas_call(
        partial(f0_prenet_kernel, t_up=T_up),
        out_shape=jax.ShapeDtypeStruct((B, C_OUT, t_grid), jnp.float32),
        grid=(B, nt),
        in_specs=[
            # the same padded input mapped three ways: 128-wide left halo,
            # full centre tile, 128-wide right halo (all lane-aligned blocks)
            pl.BlockSpec((1, C_IN, HALO), lambda b, j: (b, 0, (j + 1) * r - 1)),
            pl.BlockSpec((1, C_IN, tile), lambda b, j: (b, 0, j + 1)),
            pl.BlockSpec((1, C_IN, HALO), lambda b, j: (b, 0, (j + 2) * r)),
            # weights / biases: resident across the whole grid
            pl.BlockSpec((C_OUT, C_IN), lambda b, j: (0, 0)),
            pl.BlockSpec((C_OUT, 1), lambda b, j: (0, 0)),
            pl.BlockSpec((KERNEL_SIZES[0], C_OUT, C_IN), lambda b, j: (0, 0, 0)),
            pl.BlockSpec((C_OUT, 1), lambda b, j: (0, 0)),
            pl.BlockSpec((KERNEL_SIZES[1], C_OUT, C_OUT), lambda b, j: (0, 0, 0)),
            pl.BlockSpec((C_OUT, 1), lambda b, j: (0, 0)),
        ],
        out_specs=pl.BlockSpec((1, C_OUT, tile), lambda b, j: (b, 0, j)),
        compiler_params=pltpu.CompilerParams(
            dimension_semantics=("parallel", "parallel")),
        cost_estimate=pl.CostEstimate(
            flops=int(flops), transcendentals=0,
            bytes_accessed=int(bytes_accessed)),
    )(x_pad, x_pad, x_pad, wr_k, br_k, w0_t, b0_k, w1_t, b1_k)

    return out[:, :, :T_up] if t_grid != T_up else out


# ---------------------------------------------------------------------------
# Parameter init (deterministic, synthetic) — weight_norm effective weights,
# kept in PyTorch layout (C_out, C_in, K) / (C_out,)
# ---------------------------------------------------------------------------
def _weight_norm_eff(v, g):
    norm = jnp.sqrt(jnp.sum(v * v, axis=(1, 2), keepdims=True))
    return g[:, None, None] * v / norm


def init_params(key):
    ks = jax.random.split(key, 6)
    vr = 0.1 * jax.random.normal(ks[0], (C_OUT, C_IN, 1), jnp.float32)
    wr = _weight_norm_eff(vr, jnp.ones((C_OUT,), jnp.float32))
    br = 0.01 * jax.random.normal(ks[1], (C_OUT,), jnp.float32)
    v0 = 0.1 * jax.random.normal(ks[2], (C_OUT, C_IN, KERNEL_SIZES[0]), jnp.float32)
    w0 = _weight_norm_eff(v0, jnp.ones((C_OUT,), jnp.float32))
    b0 = 0.01 * jax.random.normal(ks[3], (C_OUT,), jnp.float32)
    v1 = 0.1 * jax.random.normal(ks[4], (C_OUT, C_OUT, KERNEL_SIZES[1]), jnp.float32)
    w1 = _weight_norm_eff(v1, jnp.ones((C_OUT,), jnp.float32))
    b1 = 0.01 * jax.random.normal(ks[5], (C_OUT,), jnp.float32)
    return ((wr, br), (w0, b0), (w1, b1))


# ---------------------------------------------------------------------------
# Pure-JAX reference (mirrors the PyTorch forward) for verification
# ---------------------------------------------------------------------------
def ref_forward(x_nct, params):
    (wr, br), (w0, b0), (w1, b1) = params

    def conv1d(h, w_oik, b, dilation, pad):
        y = lax.conv_general_dilated(
            h, w_oik, window_strides=(1,), padding=[(pad, pad)],
            rhs_dilation=(dilation,), dimension_numbers=('NCH', 'OIH', 'NCH'))
        return y + b.reshape(1, -1, 1)

    res = conv1d(x_nct, wr, br, 1, 0)
    res = jnp.repeat(res, SCALE, axis=-1)
    h = jnp.repeat(x_nct, SCALE, axis=-1)
    for w, b, k, d in ((w0, b0, KERNEL_SIZES[0], DILATIONS[0]),
                       (w1, b1, KERNEL_SIZES[1], DILATIONS[1])):
        h = jnp.where(h >= 0, h, LEAKY_SLOPE * h)
        h = conv1d(h, w, b, d, (k * d - d) // 2)
    return h + res


if __name__ == "__main__":
    key = jax.random.PRNGKey(0)
    k_x, k_p = jax.random.split(key)
    params = init_params(k_p)

    # small shape (single time tile, both sequence edges inside one tile)
    B, T = 2, 16
    x = jax.random.normal(k_x, (B, C_IN, T), jnp.float32)   # [B, C_in, T] (NCL)
    out = jax.block_until_ready(f0_prenet_pallas(x, params))
    ref = jax.block_until_ready(ref_forward(x, params))
    assert out.shape == (B, C_OUT, T * SCALE), out.shape
    assert jnp.allclose(out, ref, rtol=1e-3, atol=1e-4), float(
        jnp.max(jnp.abs(out - ref)))

    # multi-tile path: halo across time tiles + partial last tile
    x2 = jax.random.normal(jax.random.PRNGKey(1), (1, C_IN, 300), jnp.float32)
    out2 = jax.block_until_ready(f0_prenet_pallas(x2, params))
    ref2 = jax.block_until_ready(ref_forward(x2, params))
    assert out2.shape == (1, C_OUT, 300 * SCALE), out2.shape
    assert jnp.allclose(out2, ref2, rtol=1e-3, atol=1e-4), float(
        jnp.max(jnp.abs(out2 - ref2)))

    print("KERNEL_OK")
</pallas_src>

<mosaic_0001>
module attributes {stable_mosaic.version = 11 : i64} {
  func.func @f0_prenet_kernel(%arg0: i32, %arg1: i32, %arg2: memref<1x8x128xf32, #tpu.memory_space<vmem>>, %arg3: memref<1x8x128xf32, #tpu.memory_space<vmem>>, %arg4: memref<1x8x128xf32, #tpu.memory_space<vmem>>, %arg5: memref<32x8xf32, #tpu.memory_space<vmem>>, %arg6: memref<32x1xf32, #tpu.memory_space<vmem>>, %arg7: memref<3x32x8xf32, #tpu.memory_space<vmem>>, %arg8: memref<32x1xf32, #tpu.memory_space<vmem>>, %arg9: memref<3x32x32xf32, #tpu.memory_space<vmem>>, %arg10: memref<32x1xf32, #tpu.memory_space<vmem>>, %arg11: memref<1x32x128xf32, #tpu.memory_space<vmem>>) attributes {dimension_semantics = [#tpu.dimension_semantics<parallel>, #tpu.dimension_semantics<parallel>], iteration_bounds = array<i64: 2, 1>, scalar_prefetch = 0 : i64, scratch_operands = 0 : i64, tpu.core_type = #tpu.core_type<tc>, window_params = [{transform_indices = @transform_0, window_bounds = array<i64: 1, 8, 128>}, {transform_indices = @transform_1, window_bounds = array<i64: 1, 8, 128>}, {transform_indices = @transform_2, window_bounds = array<i64: 1, 8, 128>}, {pipeline_mode = #tpu.pipeline_mode<synchronous>, transform_indices = @transform_3, window_bounds = array<i64: 32, 8>}, {pipeline_mode = #tpu.pipeline_mode<synchronous>, transform_indices = @transform_4, window_bounds = array<i64: 32, 1>}, {pipeline_mode = #tpu.pipeline_mode<synchronous>, transform_indices = @transform_5, window_bounds = array<i64: 3, 32, 8>}, {pipeline_mode = #tpu.pipeline_mode<synchronous>, transform_indices = @transform_6, window_bounds = array<i64: 32, 1>}, {pipeline_mode = #tpu.pipeline_mode<synchronous>, transform_indices = @transform_7, window_bounds = array<i64: 3, 32, 32>}, {pipeline_mode = #tpu.pipeline_mode<synchronous>, transform_indices = @transform_8, window_bounds = array<i64: 32, 1>}, {transform_indices = @transform_9, window_bounds = array<i64: 1, 32, 128>}]} {
    %c0 = arith.constant 0 : index
    %c0_0 = arith.constant 0 : index
    %c0_1 = arith.constant 0 : index
    %0 = vector.load %arg2[%c0, %c0_0, %c0_1] : memref<1x8x128xf32, #tpu.memory_space<vmem>>, vector<1x8x128xf32>
    %1 = vector.shape_cast %0 : vector<1x8x128xf32> to vector<8x128xf32>
    %c0_2 = arith.constant 0 : index
    %c0_3 = arith.constant 0 : index
    %c0_4 = arith.constant 0 : index
    %2 = vector.load %arg3[%c0_2, %c0_3, %c0_4] : memref<1x8x128xf32, #tpu.memory_space<vmem>>, vector<1x8x128xf32>
    %3 = vector.shape_cast %2 : vector<1x8x128xf32> to vector<8x128xf32>
    %c0_5 = arith.constant 0 : index
    %c0_6 = arith.constant 0 : index
    %c0_7 = arith.constant 0 : index
    %4 = vector.load %arg4[%c0_5, %c0_6, %c0_7] : memref<1x8x128xf32, #tpu.memory_space<vmem>>, vector<1x8x128xf32>
    %5 = vector.shape_cast %4 : vector<1x8x128xf32> to vector<8x128xf32>
    %c0_8 = arith.constant 0 : index
    %c0_9 = arith.constant 0 : index
    %6 = vector.load %arg5[%c0_8, %c0_9] : memref<32x8xf32, #tpu.memory_space<vmem>>, vector<32x8xf32>
    %cst = arith.constant dense<0.000000e+00> : vector<32x128xf32>
    %7 = tpu.matmul %6, %3, %cst {dimension_numbers = #tpu.dot_dimension_numbers<[1], [0], [0], [1], [0, 0, 1, 1], [], []>} : vector<32x8xf32>, vector<8x128xf32>, vector<32x128xf32> -> vector<32x128xf32>
    %c0_10 = arith.constant 0 : index
    %c0_11 = arith.constant 0 : index
    %8 = vector.load %arg6[%c0_10, %c0_11] : memref<32x1xf32, #tpu.memory_space<vmem>>, vector<32x1xf32>
    %9 = vector.broadcast %8 : vector<32x1xf32> to vector<32x128xf32>
    %10 = arith.addf %7, %9 : vector<32x128xf32>
    %11 = tpu.concatenate %1, %3, %5 in 1 : vector<8x128xf32>, vector<8x128xf32>, vector<8x128xf32> -> vector<8x384xf32>
    %c128_i32 = arith.constant 128 : i32
    %12 = arith.muli %arg1, %c128_i32 : i32
    %cst_12 = arith.constant 0.000000e+00 : f32
    %13 = vector.broadcast %cst_12 : f32 to vector<8x384xf32>
    %14 = arith.cmpf oge, %11, %13 : vector<8x384xf32>
    %cst_13 = arith.constant 1.000000e-01 : f32
    %15 = vector.broadcast %cst_13 : f32 to vector<8x384xf32>
    %16 = arith.mulf %15, %11 : vector<8x384xf32>
    %17 = arith.select %14, %11, %16 : vector<8x384xi1>, vector<8x384xf32>
    %18 = vector.extract_strided_slice %17 {offsets = [0, 124], sizes = [8, 134], strides = [1, 1]} : vector<8x384xf32> to vector<8x134xf32>
    %c0_14 = arith.constant 0 : index
    %c0_15 = arith.constant 0 : index
    %c0_16 = arith.constant 0 : index
    %19 = vector.load %arg7[%c0_14, %c0_15, %c0_16] : memref<3x32x8xf32, #tpu.memory_space<vmem>>, vector<1x32x8xf32>
    %20 = vector.shape_cast %19 : vector<1x32x8xf32> to vector<32x8xf32>
    %cst_17 = arith.constant dense<0.000000e+00> : vector<32x134xf32>
    %21 = tpu.matmul %20, %18, %cst_17 {dimension_numbers = #tpu.dot_dimension_numbers<[1], [0], [0], [1], [0, 0, 1, 1], [], []>} : vector<32x8xf32>, vector<8x134xf32>, vector<32x134xf32> -> vector<32x134xf32>
    %22 = vector.extract_strided_slice %17 {offsets = [0, 125], sizes = [8, 134], strides = [1, 1]} : vector<8x384xf32> to vector<8x134xf32>
    %c1 = arith.constant 1 : index
    %c0_18 = arith.constant 0 : index
    %c0_19 = arith.constant 0 : index
    %23 = vector.load %arg7[%c1, %c0_18, %c0_19] : memref<3x32x8xf32, #tpu.memory_space<vmem>>, vector<1x32x8xf32>
    %24 = vector.shape_cast %23 : vector<1x32x8xf32> to vector<32x8xf32>
    %cst_20 = arith.constant dense<0.000000e+00> : vector<32x134xf32>
    %25 = tpu.matmul %24, %22, %cst_20 {dimension_numbers = #tpu.dot_dimension_numbers<[1], [0], [0], [1], [0, 0, 1, 1], [], []>} : vector<32x8xf32>, vector<8x134xf32>, vector<32x134xf32> -> vector<32x134xf32>
    %26 = arith.addf %21, %25 : vector<32x134xf32>
    %27 = vector.extract_strided_slice %17 {offsets = [0, 126], sizes = [8, 134], strides = [1, 1]} : vector<8x384xf32> to vector<8x134xf32>
    %c2 = arith.constant 2 : index
    %c0_21 = arith.constant 0 : index
    %c0_22 = arith.constant 0 : index
    %28 = vector.load %arg7[%c2, %c0_21, %c0_22] : memref<3x32x8xf32, #tpu.memory_space<vmem>>, vector<1x32x8xf32>
    %29 = vector.shape_cast %28 : vector<1x32x8xf32> to vector<32x8xf32>
    %cst_23 = arith.constant dense<0.000000e+00> : vector<32x134xf32>
    %30 = tpu.matmul %29, %27, %cst_23 {dimension_numbers = #tpu.dot_dimension_numbers<[1], [0], [0], [1], [0, 0, 1, 1], [], []>} : vector<32x8xf32>, vector<8x134xf32>, vector<32x134xf32> -> vector<32x134xf32>
    %31 = arith.addf %26, %30 : vector<32x134xf32>
    %c0_24 = arith.constant 0 : index
    %c0_25 = arith.constant 0 : index
    %32 = vector.load %arg8[%c0_24, %c0_25] : memref<32x1xf32, #tpu.memory_space<vmem>>, vector<32x1xf32>
    %33 = vector.broadcast %32 : vector<32x1xf32> to vector<32x134xf32>
    %34 = arith.addf %31, %33 : vector<32x134xf32>
    %cst_26 = arith.constant 0.000000e+00 : f32
    %35 = vector.broadcast %cst_26 : f32 to vector<32x134xf32>
    %36 = arith.cmpf oge, %34, %35 : vector<32x134xf32>
    %cst_27 = arith.constant 1.000000e-01 : f32
    %37 = vector.broadcast %cst_27 : f32 to vector<32x134xf32>
    %38 = arith.mulf %37, %34 : vector<32x134xf32>
    %39 = arith.select %36, %34, %38 : vector<32x134xi1>, vector<32x134xf32>
    %c-3_i32 = arith.constant -3 : i32
    %40 = arith.addi %12, %c-3_i32 : i32
    %41 = tpu.iota {dimensions = array<i32: 1>} : vector<1x134xi32>
    %42 = vector.broadcast %40 : i32 to vector<1x134xi32>
    %43 = arith.addi %42, %41 : vector<1x134xi32>
    %c0_i32 = arith.constant 0 : i32
    %44 = vector.broadcast %c0_i32 : i32 to vector<1x134xi32>
    %45 = arith.cmpi sge, %43, %44 : vector<1x134xi32>
    %c32_i32 = arith.constant 32 : i32
    %46 = vector.broadcast %c32_i32 : i32 to vector<1x134xi32>
    %47 = arith.cmpi slt, %43, %46 : vector<1x134xi32>
    %48 = arith.andi %45, %47 : vector<1x134xi1>
    %cst_28 = arith.constant 0.000000e+00 : f32
    %49 = vector.shape_cast %48 : vector<1x134xi1> to vector<1x134xi1>
    %50 = vector.broadcast %49 : vector<1x134xi1> to vector<32x134xi1>
    %51 = vector.broadcast %cst_28 : f32 to vector<32x134xf32>
    %52 = arith.select %50, %39, %51 : vector<32x134xi1>, vector<32x134xf32>
    %53 = vector.extract_strided_slice %52 {offsets = [0, 0], sizes = [32, 128], strides = [1, 1]} : vector<32x134xf32> to vector<32x128xf32>
    %c0_29 = arith.constant 0 : index
    %c0_30 = arith.constant 0 : index
    %c0_31 = arith.constant 0 : index
    %54 = vector.load %arg9[%c0_29, %c0_30, %c0_31] : memref<3x32x32xf32, #tpu.memory_space<vmem>>, vector<1x32x32xf32>
    %55 = vector.shape_cast %54 : vector<1x32x32xf32> to vector<32x32xf32>
    %cst_32 = arith.constant dense<0.000000e+00> : vector<32x128xf32>
    %56 = tpu.matmul %55, %53, %cst_32 {dimension_numbers = #tpu.dot_dimension_numbers<[1], [0], [0], [1], [0, 0, 1, 1], [], []>} : vector<32x32xf32>, vector<32x128xf32>, vector<32x128xf32> -> vector<32x128xf32>
    %57 = vector.extract_strided_slice %52 {offsets = [0, 3], sizes = [32, 128], strides = [1, 1]} : vector<32x134xf32> to vector<32x128xf32>
    %c1_33 = arith.constant 1 : index
    %c0_34 = arith.constant 0 : index
    %c0_35 = arith.constant 0 : index
    %58 = vector.load %arg9[%c1_33, %c0_34, %c0_35] : memref<3x32x32xf32, #tpu.memory_space<vmem>>, vector<1x32x32xf32>
    %59 = vector.shape_cast %58 : vector<1x32x32xf32> to vector<32x32xf32>
    %cst_36 = arith.constant dense<0.000000e+00> : vector<32x128xf32>
    %60 = tpu.matmul %59, %57, %cst_36 {dimension_numbers = #tpu.dot_dimension_numbers<[1], [0], [0], [1], [0, 0, 1, 1], [], []>} : vector<32x32xf32>, vector<32x128xf32>, vector<32x128xf32> -> vector<32x128xf32>
    %61 = arith.addf %56, %60 : vector<32x128xf32>
    %62 = vector.extract_strided_slice %52 {offsets = [0, 6], sizes = [32, 128], strides = [1, 1]} : vector<32x134xf32> to vector<32x128xf32>
    %c2_37 = arith.constant 2 : index
    %c0_38 = arith.constant 0 : index
    %c0_39 = arith.constant 0 : index
    %63 = vector.load %arg9[%c2_37, %c0_38, %c0_39] : memref<3x32x32xf32, #tpu.memory_space<vmem>>, vector<1x32x32xf32>
    %64 = vector.shape_cast %63 : vector<1x32x32xf32> to vector<32x32xf32>
    %cst_40 = arith.constant dense<0.000000e+00> : vector<32x128xf32>
    %65 = tpu.matmul %64, %62, %cst_40 {dimension_numbers = #tpu.dot_dimension_numbers<[1], [0], [0], [1], [0, 0, 1, 1], [], []>} : vector<32x32xf32>, vector<32x128xf32>, vector<32x128xf32> -> vector<32x128xf32>
    %66 = arith.addf %61, %65 : vector<32x128xf32>
    %c0_41 = arith.constant 0 : index
    %c0_42 = arith.constant 0 : index
    %67 = vector.load %arg10[%c0_41, %c0_42] : memref<32x1xf32, #tpu.memory_space<vmem>>, vector<32x1xf32>
    %68 = vector.broadcast %67 : vector<32x1xf32> to vector<32x128xf32>
    %69 = arith.addf %66, %68 : vector<32x128xf32>
    %70 = arith.addf %69, %10 : vector<32x128xf32>
    %c0_43 = arith.constant 0 : index
    %c0_44 = arith.constant 0 : index
    %c0_45 = arith.constant 0 : index
    %71 = vector.load %arg11[%c0_43, %c0_44, %c0_45] : memref<1x32x128xf32, #tpu.memory_space<vmem>>, vector<1x32x128xf32>
    %72 = vector.shape_cast %71 : vector<1x32x128xf32> to vector<32x128xf32>
    %73 = vector.shape_cast %70 : vector<32x128xf32> to vector<1x32x128xf32>
    tpu.vector_store %arg11[%c0_43, %c0_44, %c0_45], %73 {strides = array<i32>} : memref<1x32x128xf32, #tpu.memory_space<vmem>>, vector<1x32x128xf32>,
    return
  }
  func.func @transform_0(%arg0: i32, %arg1: i32) -> (i32, i32, i32) {
    %c1_i32 = arith.constant 1 : i32
    %0 = arith.addi %arg1, %c1_i32 : i32
    %c1_i32_0 = arith.constant 1 : i32
    %1 = arith.muli %0, %c1_i32_0 : i32
    %c1_i32_1 = arith.constant 1 : i32
    %2 = arith.subi %1, %c1_i32_1 : i32
    %c0_i32 = arith.constant 0 : i32
    %c0_i32_2 = arith.constant 0 : i32
    return %arg0, %c0_i32, %2 : i32, i32, i32
  }
  func.func @transform_1(%arg0: i32, %arg1: i32) -> (i32, i32, i32) {
    %c1_i32 = arith.constant 1 : i32
    %0 = arith.addi %arg1, %c1_i32 : i32
    %c0_i32 = arith.constant 0 : i32
    %c0_i32_0 = arith.constant 0 : i32
    return %arg0, %c0_i32, %0 : i32, i32, i32
  }
  func.func @transform_2(%arg0: i32, %arg1: i32) -> (i32, i32, i32) {
    %c2_i32 = arith.constant 2 : i32
    %0 = arith.addi %arg1, %c2_i32 : i32
    %c1_i32 = arith.constant 1 : i32
    %1 = arith.muli %0, %c1_i32 : i32
    %c0_i32 = arith.constant 0 : i32
    %c0_i32_0 = arith.constant 0 : i32
    return %arg0, %c0_i32, %1 : i32, i32, i32
  }
  func.func @transform_3(%arg0: i32, %arg1: i32) -> (i32, i32) {
    %c0_i32 = arith.constant 0 : i32
    %c0_i32_0 = arith.constant 0 : i32
    %c0_i32_1 = arith.constant 0 : i32
    return %c0_i32, %c0_i32_0 : i32, i32
  }
  func.func @transform_4(%arg0: i32, %arg1: i32) -> (i32, i32) {
    %c0_i32 = arith.constant 0 : i32
    %c0_i32_0 = arith.constant 0 : i32
    %c0_i32_1 = arith.constant 0 : i32
    return %c0_i32, %c0_i32_0 : i32, i32
  }
  func.func @transform_5(%arg0: i32, %arg1: i32) -> (i32, i32, i32) {
    %c0_i32 = arith.constant 0 : i32
    %c0_i32_0 = arith.constant 0 : i32
    %c0_i32_1 = arith.constant 0 : i32
    %c0_i32_2 = arith.constant 0 : i32
    return %c0_i32, %c0_i32_0, %c0_i32_1 : i32, i32, i32
  }
  func.func @transform_6(%arg0: i32, %arg1: i32) -> (i32, i32) {
    %c0_i32 = arith.constant 0 : i32
    %c0_i32_0 = arith.constant 0 : i32
    %c0_i32_1 = arith.constant 0 : i32
    return %c0_i32, %c0_i32_0 : i32, i32
  }
  func.func @transform_7(%arg0: i32, %arg1: i32) -> (i32, i32, i32) {
    %c0_i32 = arith.constant 0 : i32
    %c0_i32_0 = arith.constant 0 : i32
    %c0_i32_1 = arith.constant 0 : i32
    %c0_i32_2 = arith.constant 0 : i32
    return %c0_i32, %c0_i32_0, %c0_i32_1 : i32, i32, i32
  }
  func.func @transform_8(%arg0: i32, %arg1: i32) -> (i32, i32) {
    %c0_i32 = arith.constant 0 : i32
    %c0_i32_0 = arith.constant 0 : i32
    %c0_i32_1 = arith.constant 0 : i32
    return %c0_i32, %c0_i32_0 : i32, i32
  }
  func.func @transform_9(%arg0: i32, %arg1: i32) -> (i32, i32, i32) {
    %c0_i32 = arith.constant 0 : i32
    %c0_i32_0 = arith.constant 0 : i32
    return %arg0, %c0_i32, %arg1 : i32, i32, i32
  }
}

</mosaic_0001>

<bundles_post_ra>
// kernel: tpu_custom_call.1
= control target key start
LH: loop header
LB: loop body
LE: loop exit
PB: predicated region body
PF: predicated region fallthrough
CT: control target
= control target key end

     0   :  { %14 = vsyncpa [#allocation3], 0  ;;  %s2329_s0 = inlined_call_operand.vmem [shape: f32[2,8,384], index: 0, kind: input, shape index: {}]   ;;  %s2330_s1 = inlined_call_operand.vmem [shape: f32[2,8,384], index: 1, kind: input, shape index: {}]   ;;  %s2331_s2 = inlined_call_operand.vmem [shape: f32[2,8,384], index: 2, kind: input, shape index: {}]   ;;  %s2332_s3 = inlined_call_operand.vmem [shape: f32[32,8], index: 3, kind: input, shape index: {}]   ;;  %s2333_s4 = inlined_call_operand.vmem [shape: f32[32,1], index: 4, kind: input, shape index: {}]   ;;  %s2334_s5 = inlined_call_operand.vmem [shape: f32[3,32,8], index: 5, kind: input, shape index: {}]   ;;  %s2335_s6 = inlined_call_operand.vmem [shape: f32[32,1], index: 6, kind: input, shape index: {}]   ;;  %s2336_s7 = inlined_call_operand.vmem [shape: f32[3,32,32], index: 7, kind: input, shape index: {}]   ;;  %s2337_s8 = inlined_call_operand.vmem [shape: f32[32,1], index: 8, kind: input, shape index: {}]   ;;  %s2338_s9 = inlined_call_operand.hbm [shape: f32[2,32,128], index: 9, kind: output, shape index: {}]  }
   0x1   :  { %16 = vsyncpa [#allocation3 + $0x1], 0  ;;  %s1989_s30 = smov 0   ;;  %s1991_s10 = smov 0  }
   0x2   :  { %s1993_s11 = smov 0   ;;  %s1995_s12 = smov 0  }
   0x3   :  { %s1997_s13 = smov 0   ;;  %s1999_s14 = smov 0  }
   0x4 LB: > { %2341 = sst [smem:[#allocation5_spill]] %s1923_s13  ;;  %s1546_s15 = sadd.s32 4294967295, %s1927_s14   ;;  %s1927_s14 = sphi %s1999_s14, %s22_s14   ;;  %s1923_s13 = sphi %s1997_s13, %s2352_s13   ;;  %s1919_s12 = sphi %s1995_s12, %s2351_s12   ;;  %s1915_s11 = sphi %s1993_s11, %s2355_s11   ;;  %s1911_s10 = sphi %s1991_s10, %s2354_s10   ;;  %s1907_s30 = sphi %s1989_s30, %s2353_s30  }
   0x5   : > { %s1547_s16 = sadd.s32 4294967294, %s1927_s14   ;;  %s34_s17 = sadd.s32 1, %s1923_s13 }
   0x6   : > { %s257_s18 = sadd.s32 1, %s1915_s11  ;;  %p36_p0 = scmp.ge.s32.totalorder %s34_s17, 2 }
   0x7   : > { %p267_p1 = scmp.ne.s32.totalorder %s1915_s11, %s1911_s10  ;;  %p268_p2 = scmp.eq.s32.totalorder %s1546_s15, 1 }
   0x8   : > { %p273_p3 = scmp.ne.s32.totalorder %s1911_s10, %s1907_s30  ;;  %s2357_s17 = smov (%p36_p0, %s34_s17), 0 }
   0x9   : > { %2342 = sst [smem:[#allocation6_spill]] %s2357_s17  ;;  %p2029_p4 = por %p268_p2, %p267_p1 }
   0xa   : > { %p274_p5 = scmp.eq.s32.totalorder %s1547_s16, 1  ;;  %s252_s20 = ssub.s32 %s1923_s13, %s2357_s17 }
   0xb   : > { %p1550_p6 = scmp.ge.s32.totalorder %s1927_s14, 1  ;;  %p255_p7 = scmp.eq.s32.totalorder %s252_s20, 0 }
   0xc   : > { %p2036_p8 = por %p274_p5, %p273_p3  ;;  %p347_p9 = scmp.lt.s32.totalorder %s1927_s14, 3 }
   0xd   : > { %s2042_s22 = scalar_select %p255_p7, %s1915_s11, %s257_s18  }
   0xe   : > { %p348_p10 = pnand %p1550_p6, %p347_p9 }
   0xf   : > { %2345 = sst [smem:[#allocation7_spill]] %s2042_s22  ;;  %p404_p11 = scmp.lt.s32.totalorder (!%p348_p10), %s1919_s12, 1  ;;  %v435_v0 = vld [vmem:[%s2332_s3] sm:$0xff] (!%p348_p10)  ;;  %vm463_vm0 = vcmask (!%p348_p10), 64512   ;;  %v1929_v1 = vmov (!%p348_p10), 0.0   ;;  %v436_v5 = vld [vmem:[%s2332_s3 + $0x8] sm:$0xff] (!%p348_p10)  ;;  %v989_v57 = vlaneseq (!%p348_p10) }
  0x10   : > { %351 = sbr.rel (%p348_p10) target bundleno = 781 (0x30d), region = 56  ;;  %1644 = vmatprep.mubr.msk.f32.mxu1 (!%p348_p10), %vm463_vm0, %v435_v0  ;;  %782 = vmatprep.mubr.f32.mxu0 (!%p348_p10), %v1929_v1  ;;  %v437_v8 = vld [vmem:[%s2332_s3 + $0x10] sm:$0xff] (!%p348_p10)  ;;  %v438_v12 = vld [vmem:[%s2332_s3 + $0x18] sm:$0xff] (!%p348_p10)  ;;  %s1931_s22 = smov (!%p348_p10), 4   ;;  %v932_v14 = vld [vmem:[%s2335_s6] sm:$0xff] (!%p348_p10)  ;;  %v1933_v16 = vmov (!%p348_p10), 0  }
  0x11   : > { %v933_v15 = vld [vmem:[%s2335_s6 + $0x8] sm:$0xff] (!%p348_p10)  ;;  %1807 = vset.pattern.permute.xlu1 (!%p348_p10), %v1933_v16  ;;  %1808 = vset.pattern.permute.xlu0 (!%p348_p10), %v1933_v16  ;;  %v934_v17 = vld [vmem:[%s2335_s6 + $0x10] sm:$0xff] (!%p348_p10)  ;;  %v935_v18 = vld [vmem:[%s2335_s6 + $0x18] sm:$0xff] (!%p348_p10)  ;;  %vm589_vm4 = vcmask (!%p348_p10), 23552   ;;  %vm701_vm5 = vcmask (!%p348_p10), 31744   ;;  %vm818_vm6 = vcmask (!%p348_p10), 15360  }
  0x12   : > { %v1559_v24 = vld [vmem:[%s2334_s5 + $0x20] sm:$0xff] (!%p348_p10)  ;;  %v1560_v30 = vld [vmem:[%s2334_s5 + $0x28] sm:$0xff] (!%p348_p10)  ;;  %v1561_v35 = vld [vmem:[%s2334_s5 + $0x30] sm:$0xff] (!%p348_p10)  ;;  %v990_v63 = vand.u32 (!%p348_p10), 127, %v989_v57  ;;  %vm1055_vm14 = vcmask (!%p348_p10), 261120   ;;  %s1935_s27 = smov (!%p348_p10), 122  }
  0x13   : > { %v571_v31 = vld [vmem:[%s2334_s5] sm:$0xff] (!%p348_p10)  ;;  %v572_v36 = vld [vmem:[%s2334_s5 + $0x8] sm:$0xff] (!%p348_p10)  ;;  %v1562_v39 = vld [vmem:[%s2334_s5 + $0x38] sm:$0xff] (!%p348_p10)  ;;  %vm1046_vm15 = vcmask (!%p348_p10), 1022976   ;;  %s1612_s28 = sshll.u32 (!%p348_p10), %s1919_s12, 9 }
  0x14   : > { %v573_v40 = vld [vmem:[%s2334_s5 + $0x10] sm:$0xff] (!%p348_p10)  ;;  %v1571_v41 = vld [vmem:[%s2334_s5 + $0x40] sm:$0xff] (!%p348_p10)  ;;  %v574_v42 = vld [vmem:[%s2334_s5 + $0x18] sm:$0xff] (!%p348_p10)  ;;  %s2279_s17 = scalar_lea.hbm (!%p348_p10), %s2338_s9, %s1612_s28 }
  0x15   : > { %v1572_v43 = vld [vmem:[%s2334_s5 + $0x48] sm:$0xff] (!%p348_p10)  ;;  %v1573_v44 = vld [vmem:[%s2334_s5 + $0x50] sm:$0xff] (!%p348_p10)  ;;  %v1574_v45 = vld [vmem:[%s2334_s5 + $0x58] sm:$0xff] (!%p348_p10) }
  0x16   : > { %v442_v57 = vld [vmem:[%s2333_s4 + $0x18] sm:$0xff] (!%p348_p10) }
  0x17   : > { %s405_s25 = scalar_select %p404_p11, %s1919_s12, 1 }
  0x19   : > { %s1740_s26 = smul.u32 24, %s405_s25 }
  0x1b   : > { %s411_s29 = scalar_lea.vmem %s2329_s0, %s1740_s26  ;;  %s1609_s15 = sadd.s32 8, %s1740_s26 }
  0x1c   : > { %v432_v2 = vld [vmem:[%s411_s29] sm:$0xff]  ;;  %s420_s20 = scalar_lea.vmem %s2330_s1, %s1609_s15  ;;  %s1611_s23 = sadd.s32 16, %s1740_s26 }
  0x1d   : > { %vm562_vm1 = vcmp.ge.f32.partialorder %v432_v2, 0.0  ;;  %v565_v3 = vmul.f32 0.1, %v432_v2  ;;  %v433_v4 = vld [vmem:[%s420_s20] sm:$0xff]  ;;  %s430_s25 = scalar_lea.vmem %s2331_s2, %s1611_s23  ;;  %s1930_s26 = smov 3  }
  0x1e   : > { %vm563_vm2 = vcmp.ge.f32.partialorder %v433_v4, 0.0  ;;  %v566_v6 = vmul.f32 0.1, %v433_v4  ;;  %v434_v7 = vld [vmem:[%s430_s25] sm:$0xff]  ;;  %1642 = vmatprep.subr.mxu1 %v433_v4  ;;  %s1932_s29 = smov 2   ;;  %s1934_s23 = smov 125  }
  0x1f   : > { %v568_v9 = vsel %vm562_vm1, %v432_v2, %v565_v3  ;;  %vm564_vm3 = vcmp.ge.f32.partialorder %v434_v7, 0.0  ;;  %v567_v10 = vmul.f32 0.1, %v434_v7  ;;  %1643 = vmatpush3.msra.mxu1 %v433_v4  ;;  %vm1271_vm1 = vcmask 998400  }
  0x20   : > { %583 = vrot.lane.b32.xlu1 %v568_v9, %s1930_s26  ;;  %v569_v11 = vsel %vm563_vm2, %v433_v4, %v566_v6  ;;  %1645 = vmatmul.mubr.msk.f32.vlgmr.msra.gmra.mrb[0].mxu1 %vm463_vm0, %v436_v5  ;;  %v993_v6 = vadd.s32 4294967293, %v990_v63 }
  0x21   : > { %585 = vrot.lane.b32.xlu0 %v569_v11, %s1930_s26  ;;  %1647 = vmatprep.mubr.msk.f32.mxu1 %vm463_vm0, %v437_v8  ;;  %v570_v13 = vsel %vm564_vm3, %v434_v7, %v567_v10 }
  0x22   : > { %vm995_vm7 = vcmp.ge.s32.totalorder %v993_v6, 0  ;;  %vm997_vm8 = vcmp.lt.s32.totalorder %v993_v6, 32 }
  0x23   : > { %vm2151_vm10 = vmand %vm995_vm7, %vm997_vm8 }
  0x24   : > { %695 = vrot.lane.b32.xlu1 %v568_v9, %s1931_s22  ;;  %1648 = vmatmul.mubr.msk.f32.gmra.mrb[2].mxu1 %vm463_vm0, %v438_v12 }
  0x25   : > { %587 = vrot.lane.b32.xlu0 %v570_v13, %s1930_s26  ;;  %670 = vmatprep.mubr.f32.mxu1 %v1929_v1 }
  0x28   : > { %697 = vrot.lane.b32.xlu1 %v569_v11, %s1931_s22 }
  0x29   : > { %699 = vrot.lane.b32.xlu0 %v570_v13, %s1931_s22 }
  0x2c   : > { %816 = vrot.lane.b32.xlu1 %v570_v13, %s1932_s29 }
  0x2d   : > { %814 = vrot.lane.b32.xlu0 %v569_v11, %s1932_s29 }
  0x30   : > { %938 = vperm.xlu1 %1807, %v932_v14  }
  0x31   : > { %812 = vrot.lane.b32.xlu0 %v568_v9, %s1932_s29  ;;  %s1936_s29 = smov [#allocation2]  }
  0x32   : > { %s1853_s15 = sshll.u32 %s1936_s29, 4  ;;  %s1854_s15 = int_to_ptr.vmem [resolvable:$false] %s1853_s15 }
  0x33   : > { %s1855_s16 = scalar_lea.vmem %s1854_s15, 1024 }
  0x34   : > { %948 = vperm.xlu1 %1807, %v934_v17  }
  0x35   : > { %943 = vperm.xlu0 %1808, %v933_v15  }
  0x38   : > { %953 = vperm.xlu1 %1807, %v935_v18  }
  0x92   : > { %v584_v19 = vpop.permute.xlu1 %583 }
  0x93   : > { %v586_v20 = vpop.permute.xlu0 %585 }
  0x94   : > { %v590_v25 = vsel %vm589_vm4, %v584_v19, %v586_v20 }
  0x96   : > { %v696_v21 = vpop.permute.xlu1 %695 }
  0x97   : > { %v588_v22 = vpop.permute.xlu0 %587 }
  0x98   : > { %v591_v23 = vsel %vm589_vm4, %v586_v20, %v588_v22  ;;  %v1581_v20 = vld [vmem:[%s2336_s7 + $0x30] sm:$0xff] }
  0x99   : > { %606 = vmatprep.subr.mxu1 %v591_v23 }
  0x9a   : > { %607 = vmatpush1.msra.mxu1 %v590_v25  ;;  %v698_v26 = vpop.permute.xlu1 %697 }
  0x9b   : > { %v700_v27 = vpop.permute.xlu0 %699  ;;  %1563 = vmatmul.mubr.msk.f32.vlgmr.msra.gmra.mrb[4].mxu1 %vm463_vm0, %v1559_v24  ;;  %v702_v28 = vsel %vm701_vm5, %v696_v21, %v698_v26 }
  0x9c   : > { %v703_v29 = vsel %vm701_vm5, %v698_v26, %v700_v27  ;;  %676 = vmatprep.mubr.f32.mxu1 %v1929_v1 }
  0x9d   : > { %718 = vmatprep.subr.mxu0 %v703_v29 }
  0x9e   : > { %719 = vmatpush1.msra.mxu0 %v702_v28  ;;  %v817_v32 = vpop.permute.xlu1 %816 }
  0x9f   : > { %v815_v33 = vpop.permute.xlu0 %814  ;;  %1564 = vmatmul.mubr.msk.f32.gmra.mrb[6].mxu1 %vm463_vm0, %v1560_v30  ;;  %1567 = vmatmul.mubr.msk.f32.vlgmr.msra.gmra.mrb[0].mxu0 %vm463_vm0, %v571_v31 }
  0xa0   : > { %v820_v34 = vsel %vm818_vm6, %v815_v33, %v817_v32  ;;  %682 = vmatprep.mubr.f32.mxu1 %v1929_v1  ;;  %788 = vmatprep.mubr.f32.mxu0 %v1929_v1 }
  0xa1   : > { %835 = vmatprep.subr.mxu1 %v820_v34 }
  0xa3   : > { %v813_v37 = vpop.permute.xlu0 %812  ;;  %1565 = vmatmul.mubr.msk.f32.gmra.mrb[8].mxu1 %vm463_vm0, %v1561_v35  ;;  %1568 = vmatmul.mubr.msk.f32.gmra.mrb[2].mxu0 %vm463_vm0, %v572_v36 }
  0xa4   : > { %v819_v38 = vsel %vm818_vm6, %v813_v37, %v815_v33  ;;  %688 = vmatprep.mubr.f32.mxu1 %v1929_v1  ;;  %794 = vmatprep.mubr.f32.mxu0 %v1929_v1 }
  0xa5   : > { %836 = vmatpush1.msra.mxu1 %v819_v38 }
  0xa7   : > { %1566 = vmatmul.mubr.msk.f32.gmra.mrb[10].mxu1 %vm463_vm0, %v1562_v39  ;;  %1569 = vmatmul.mubr.msk.f32.gmra.mrb[4].mxu0 %vm463_vm0, %v573_v40 }
  0xa8   : > { %899 = vmatprep.mubr.f32.mxu1 %v1929_v1  ;;  %800 = vmatprep.mubr.f32.mxu0 %v1929_v1 }
  0xab   : > { %1575 = vmatmul.mubr.msk.f32.vlgmr.msra.gmra.mrb[12].mxu1 %vm463_vm0, %v1571_v41  ;;  %1570 = vmatmul.mubr.msk.f32.gmra.mrb[6].mxu0 %vm463_vm0, %v574_v42 }
  0xac   : > { %905 = vmatprep.mubr.f32.mxu1 %v1929_v1 }
  0xaf   : > { %1576 = vmatmul.mubr.msk.f32.gmra.mrb[14].mxu1 %vm463_vm0, %v1572_v43  ;;  %v939_v13 = vpop.permute.xlu1 %938 }
  0xb0   : > { %911 = vmatprep.mubr.f32.mxu1 %v1929_v1 }
  0xb3   : > { %1577 = vmatmul.mubr.msk.f32.gmra.mrb[16].mxu1 %vm463_vm0, %v1573_v44  ;;  %v949_v23 = vpop.permute.xlu1 %948 }
  0xb4   : > { %917 = vmatprep.mubr.f32.mxu1 %v1929_v1  ;;  %v944_v16 = vpop.permute.xlu0 %943 }
  0xb7   : > { %1578 = vmatmul.mubr.msk.f32.gmra.mrb[18].mxu1 %vm463_vm0, %v1574_v45  ;;  %v954_v39 = vpop.permute.xlu1 %953  ;;  %v1579_v45 = vld [vmem:[%s2336_s7 + $0x20] sm:$0xff]  ;;  %vm2202_vm0 = vmpackc.low %vm2151_vm10, %vm2151_vm10 }
  0xb8   : > { %1658 = vmatprep.mubr.msk.f32.mxu0 %vm1055_vm14, %v1579_v45  ;;  %v1598_v45 = vld [vmem:[%s2336_s7 + $0x58] sm:$0xff] }
  0xf3   : > { %v2143_v46 = vpop.f32.mrb[0].mxu1 }
  0xf4   : > { %v2145_v47 = vpop.f32.mrb[1].mxu1 }
  0xf7   : > { %v2147_v48 = vpop.f32.mrb[2].mxu1 }
  0xf8   : > { %v2149_v49 = vpop.f32.mrb[3].mxu1 }
 0x16e   : > { %v672_v50 = vpop.f32.mrb[4].mxu1 }
 0x16f   : > { %v674_v51 = vpop.f32.mrb[5].mxu1 }
 0x172   : > { %v784_v52 = vpop.f32.mrb[0].mxu0  ;;  %v678_v53 = vpop.f32.mrb[6].mxu1 }
 0x173   : > { %v785_v54 = vadd.f32 %v784_v52, %v672_v50  ;;  %v786_v55 = vpop.f32.mrb[1].mxu0  ;;  %v680_v56 = vpop.f32.mrb[7].mxu1 }
 0x174   : > { %v441_v55 = vld [vmem:[%s2333_s4 + $0x10] sm:$0xff]  ;;  %v440_v56 = vld [vmem:[%s2333_s4 + $0x8] sm:$0xff] }
 0x176   : > { %v790_v58 = vpop.f32.mrb[2].mxu0  ;;  %v684_v59 = vpop.f32.mrb[8].mxu1 }
 0x177   : > { %v791_v60 = vadd.f32 %v790_v58, %v678_v53  ;;  %v792_v61 = vpop.f32.mrb[3].mxu0  ;;  %v686_v62 = vpop.f32.mrb[9].mxu1  ;;  %v1383_v58 = vld [vmem:[%s2337_s8 + $0x10] sm:$0xff] }
 0x17a   : > { %v796_v0 = vpop.f32.mrb[4].mxu0  ;;  %v690_v2 = vpop.f32.mrb[10].mxu1 }
 0x17b   : > { %v797_v3 = vadd.f32 %v796_v0, %v684_v59  ;;  %v692_v4 = vpop.f32.mrb[11].mxu1  ;;  %v798_v5 = vpop.f32.mrb[5].mxu0  ;;  %v1382_v59 = vld [vmem:[%s2337_s8 + $0x8] sm:$0xff] }
 0x17e   : > { %v901_v7 = vpop.f32.mrb[12].mxu1  ;;  %v802_v8 = vpop.f32.mrb[6].mxu0 }
 0x17f   : > { %v924_v9 = vadd.f32 %v901_v7, %v785_v54  ;;  %v803_v10 = vadd.f32 %v802_v8, %v690_v2  ;;  %v903_v11 = vpop.f32.mrb[13].mxu1  ;;  %v804_v12 = vpop.f32.mrb[7].mxu0  ;;  %v439_v54 = vld [vmem:[%s2333_s4] sm:$0xff] }
 0x181   : > { %v956_v14 = vadd.f32 %v939_v13, %v924_v9 }
 0x182   : > { %v907_v15 = vpop.f32.mrb[14].mxu1 }
 0x183   : > { %vm964_vm9 = vcmp.ge.f32.partialorder %v956_v14, 0.0  ;;  %v972_v17 = vmul.f32 0.1, %v956_v14  ;;  %v926_v18 = vadd.f32 %v907_v15, %v791_v60  ;;  %v909_v19 = vpop.f32.mrb[15].mxu1  ;;  %v1384_v60 = vld [vmem:[%s2337_s8 + $0x18] sm:$0xff] }
 0x185   : > { %v980_v21 = vsel %vm964_vm9, %v956_v14, %v972_v17  ;;  %v958_v22 = vadd.f32 %v944_v16, %v926_v18 }
 0x186   : > { %v913_v24 = vpop.f32.mrb[16].mxu1  ;;  %v1005_v25 = vsel %vm2151_vm10, %v980_v21, 0.0 }
 0x187   : > { %vm966_vm11 = vcmp.ge.f32.partialorder %v958_v22, 0.0  ;;  %v974_v26 = vmul.f32 0.1, %v958_v22  ;;  %v928_v27 = vadd.f32 %v913_v24, %v797_v3  ;;  %v915_v28 = vpop.f32.mrb[17].mxu1  ;;  %v1809_v29 = vpack.i.bf16 %v1929_v1, %v1005_v25 }
 0x189   : > { %v982_v30 = vsel %vm966_vm11, %v958_v22, %v974_v26  ;;  %v960_v31 = vadd.f32 %v949_v23, %v928_v27  ;;  %1810 = vrot.lane.b32.xlu0 %v1809_v29, %s1934_s23  ;;  %v1580_v22 = vld [vmem:[%s2336_s7 + $0x28] sm:$0xff] }
 0x18a   : > { %v2158_v32 = vpack.c.bf16 %v982_v30, %v980_v21  ;;  %v919_v33 = vpop.f32.mrb[18].mxu1  ;;  %v1007_v34 = vsel %vm2151_vm10, %v982_v30, 0.0 }
 0x18b   : > { %vm968_vm12 = vcmp.ge.f32.partialorder %v960_v31, 0.0  ;;  %v976_v35 = vmul.f32 0.1, %v960_v31  ;;  %v930_v36 = vadd.f32 %v919_v33, %v803_v10  ;;  %v1814_v37 = vpack.i.bf16 %v1929_v1, %v1007_v34  ;;  %v921_v38 = vpop.f32.mrb[19].mxu1 }
 0x18c   : > { %v1015_v38 = vld [vmem:[%s2336_s7 + $0x10] sm:$0xff] }
 0x18d   : > { %v962_v40 = vadd.f32 %v954_v39, %v930_v36  ;;  %1815 = vrot.lane.b32.xlu1 %v1814_v37, %s1934_s23  ;;  %v984_v41 = vsel %vm968_vm12, %v960_v31, %v976_v35  ;;  %v1013_v31 = vld [vmem:[%s2336_s7] sm:$0xff]  ;;  %v1014_v36 = vld [vmem:[%s2336_s7 + $0x8] sm:$0xff] }
 0x18e   : > { %v1009_v42 = vsel %vm2151_vm10, %v984_v41, 0.0 }
 0x18f   : > { %vm970_vm13 = vcmp.ge.f32.partialorder %v962_v40, 0.0  ;;  %v978_v43 = vmul.f32 0.1, %v962_v40  ;;  %v1819_v44 = vpack.i.bf16 %v1929_v1, %v1009_v42  ;;  %v1595_v42 = vld [vmem:[%s2336_s7 + $0x40] sm:$0xff] }
 0x191   : > { %1820 = vrot.lane.b32.xlu0 %v1819_v44, %s1934_s23  ;;  %v986_v50 = vsel %vm970_vm13, %v962_v40, %v978_v43  ;;  %v1596_v43 = vld [vmem:[%s2336_s7 + $0x48] sm:$0xff] }
 0x192   : > { %v1011_v51 = vsel %vm2151_vm10, %v986_v50, 0.0  ;;  %v2172_v52 = vpack.c.bf16 %v986_v50, %v984_v41  ;;  %v1016_v41 = vld [vmem:[%s2336_s7 + $0x18] sm:$0xff] }
 0x193   : > { %v1824_v53 = vpack.i.bf16 %v1929_v1, %v1011_v51  ;;  %v1381_v1 = vld [vmem:[%s2337_s8] sm:$0xff] }
 0x195   : > { %1830 = vrot.lane.b32.xlu0 %v1809_v29, %s1935_s27  ;;  %1825 = vrot.lane.b32.xlu1 %v1824_v53, %s1934_s23  ;;  %v1582_v29 = vld [vmem:[%s2336_s7 + $0x38] sm:$0xff]  ;;  %s401_s23 = sand.u32 1, %s1911_s10  }
 0x196   : > { %s1551_s24 = sshll.u32 %s401_s23, 5  ;;  %s2283_s12 = scalar_lea.sflag [#allocation3], %s401_s23 }
 0x197   : > { %s403_s25 = scalar_lea.vmem [#allocation2], %s1551_s24 }
 0x199   : > { %1840 = vrot.lane.b32.xlu0 %v1819_v44, %s1935_s27  ;;  %1835 = vrot.lane.b32.xlu1 %v1814_v37, %s1935_s27  ;;  %v1597_v44 = vld [vmem:[%s2336_s7 + $0x50] sm:$0xff] }
 0x19d   : > { %445 = vperm.xlu0 %1808, %v439_v54   ;;  %1845 = vrot.lane.b32.xlu1 %v1824_v53, %s1935_s27  ;;  %s1432_s27 = sshll.u32 %s403_s25, 4  ;;  %s2274_s27 = int_to_ptr.vmem [resolvable:$true] %s1432_s27 }
 0x19e   : > { %s1849_s22 = scalar_lea.vmem %s2274_s27, 512  ;;  %p1856_p1 = scmp.lt.s32.totalorder %s2274_s27, %s1854_s15 }
 0x19f   : > { %p1850_p12 = scmp.ne.s32.totalorder %s2274_s27, %s1849_s22  ;;  %p1857_p2 = scmp.lt.s32.totalorder %s1855_s16, %s1849_s22 }
 0x1a1   : > { %455 = vperm.xlu0 %1808, %v441_v55   ;;  %450 = vperm.xlu1 %1807, %v440_v56   ;;  %p1851_p13 = pnand %p1850_p12, %p2029_p4  ;;  %p1858_p3 = por %p1857_p2, %p1856_p1 }
 0x1a3   : > { %p1852_p0 = pneg %p1851_p13 }
 0x1a5   : > { %1387 = vperm.xlu0 %1808, %v1381_v1   ;;  %460 = vperm.xlu1 %1807, %v442_v57   ;;  %p1859_p5 = pnand %p1858_p3, %p1852_p0 }
 0x1a9   : > { %1397 = vperm.xlu0 %1808, %v1383_v58   ;;  %1392 = vperm.xlu1 %1807, %v1382_v59  }
 0x1ad   : > { %1402 = vperm.xlu1 %1807, %v1384_v60  }
 0x1fb   : > { %v1811_v61 = vpop.permute.xlu0 %1810 }
 0x1fc   : > { %v1813_v62 = vunpack.i.h.bf16 %v1811_v61  ;;  %v1812_v63 = vunpack.i.l.bf16 %v1811_v61 }
 0x1fe   : > { %v1047_v4 = vsel %vm1046_vm15, %v1812_v63, %v1813_v62 }
 0x1ff   : > { %v1816_v0 = vpop.permute.xlu1 %1815 }
 0x200   : > { %v1818_v2 = vunpack.i.h.bf16 %v1816_v0  ;;  %v1817_v3 = vunpack.i.l.bf16 %v1816_v0 }
 0x202   : > { %v1048_v5 = vsel %vm1046_vm15, %v1817_v3, %v1818_v2 }
 0x203   : > { %v1821_v6 = vpop.permute.xlu0 %1820  ;;  %v1692_v7 = vpack.c.bf16 %v1048_v5, %v1047_v4 }
 0x204   : > { %v1823_v8 = vunpack.i.h.bf16 %v1821_v6  ;;  %v1822_v9 = vunpack.i.l.bf16 %v1821_v6 }
 0x205   : > { %1693 = vmatprep.subr.bf16.mxu0 %v1692_v7 }
 0x206   : > { %1695 = vmatpush3.bf16.msra.mxu0 %v1692_v7  ;;  %v1049_v13 = vsel %vm1046_vm15, %v1822_v9, %v1823_v8 }
 0x207   : > { %v1826_v10 = vpop.permute.xlu1 %1825  ;;  %v1831_v15 = vpop.permute.xlu0 %1830 }
 0x208   : > { %v1828_v11 = vunpack.i.h.bf16 %v1826_v10  ;;  %v1827_v12 = vunpack.i.l.bf16 %v1826_v10  ;;  %v1833_v24 = vunpack.i.h.bf16 %v1831_v15  ;;  %v1832_v25 = vunpack.i.l.bf16 %v1831_v15 }
 0x20a   : > { %v1050_v14 = vsel %vm1046_vm15, %v1827_v12, %v1828_v11 }
 0x20b   : > { %v1836_v16 = vpop.permute.xlu1 %1835  ;;  %v1696_v17 = vpack.c.bf16 %v1050_v14, %v1049_v13  ;;  %v1841_v26 = vpop.permute.xlu0 %1840 }
 0x20c   : > { %v1838_v19 = vunpack.i.h.bf16 %v1836_v16  ;;  %v1837_v21 = vunpack.i.l.bf16 %v1836_v16  ;;  %v1843_v33 = vunpack.i.h.bf16 %v1841_v26  ;;  %v1842_v34 = vunpack.i.l.bf16 %v1841_v26 }
 0x20d   : > { %1697 = vmatprep.subr.bf16.mxu0 %v1696_v17 }
 0x20e   : > { %1699 = vmatpush3.bf16.msra.mxu0 %v1696_v17  ;;  %v1273_v30 = vsel %vm1271_vm1, %v1837_v21, %v1838_v19  ;;  %v1274_v39 = vsel %vm1271_vm1, %v1842_v34, %v1843_v33 }
 0x20f   : > { %v1846_v23 = vpop.permute.xlu1 %1845  ;;  %1702 = vmatprep.subr.msk.bf16.mxu0 %vm2202_vm0, %v2158_v32 }
 0x210   : > { %v1848_v27 = vunpack.i.h.bf16 %v1846_v23  ;;  %v1847_v28 = vunpack.i.l.bf16 %v1846_v23 }
 0x211   : > { %1659 = vmatmul.mubr.msk.f32.vlgmr.msra.gmra.mrb[8].mxu0 %vm1055_vm14, %v1580_v22 }
 0x212   : > { %1705 = vmatpush3.bf16.msk.msra.mxu0 %vm2202_vm0, %v2158_v32  ;;  %1661 = vmatprep.mubr.msk.f32.mxu0 %vm1055_vm14, %v1581_v20  ;;  %v1272_v32 = vsel %vm1271_vm1, %v1832_v25, %v1833_v24  ;;  %v1275_v37 = vsel %vm1271_vm1, %v1847_v28, %v1848_v27 }
 0x213   : > { %1708 = vmatprep.subr.msk.bf16.mxu0 %vm2202_vm0, %v2172_v52  ;;  %v1712_v35 = vpack.c.bf16 %v1273_v30, %v1272_v32  ;;  %v1716_v40 = vpack.c.bf16 %v1275_v37, %v1274_v39 }
 0x215   : > { %1662 = vmatmul.mubr.msk.f32.gmra.mrb[10].mxu0 %vm1055_vm14, %v1582_v29 }
 0x216   : > { %1711 = vmatpush3.bf16.msk.msra.mxu0 %vm2202_vm0, %v2172_v52  ;;  %1672 = vmatprep.mubr.msk.f32.mxu0 %vm1055_vm14, %v1013_v31 }
 0x217   : > { %1713 = vmatprep.subr.bf16.mxu0 %v1712_v35 }
 0x219   : > { %1673 = vmatmul.mubr.msk.f32.vlgmr.msra.gmra.mrb[8].mxu0 %vm1055_vm14, %v1014_v36 }
 0x21a   : > { %1715 = vmatpush3.bf16.msra.mxu0 %v1712_v35  ;;  %1675 = vmatprep.mubr.msk.f32.mxu0 %vm1055_vm14, %v1015_v38 }
 0x21b   : > { %1717 = vmatprep.subr.bf16.mxu0 %v1716_v40 }
 0x21c   : > { %v446_v51 = vpop.permute.xlu0 %445 }
 0x21d   : > { %1676 = vmatmul.mubr.msk.f32.gmra.mrb[10].mxu0 %vm1055_vm14, %v1016_v41  ;;  %v543_v55 = vadd.f32 %v2145_v47, %v446_v51 }
 0x21e   : > { %1719 = vmatpush3.bf16.msra.mxu0 %v1716_v40  ;;  %1686 = vmatprep.mubr.msk.f32.mxu0 %vm1055_vm14, %v1595_v42 }
 0x220   : > { %v451_v50 = vpop.permute.xlu1 %450  ;;  %v456_v53 = vpop.permute.xlu0 %455 }
 0x221   : > { %1687 = vmatmul.mubr.msk.f32.vlgmr.msra.gmra.mrb[8].mxu0 %vm1055_vm14, %v1596_v43  ;;  %v548_v54 = vadd.f32 %v2143_v46, %v451_v50  ;;  %v553_v63 = vadd.f32 %v2149_v49, %v456_v53 }
 0x222   : > { %1689 = vmatprep.mubr.msk.f32.mxu0 %vm1055_vm14, %v1597_v44 }
 0x224   : > { %v461_v52 = vpop.permute.xlu1 %460  ;;  %v1388_v57 = vpop.permute.xlu0 %1387 }
 0x225   : > { %1690 = vmatmul.mubr.msk.f32.gmra.mrb[10].mxu0 %vm1055_vm14, %v1598_v45  ;;  %v558_v61 = vadd.f32 %v2147_v48, %v461_v52 }
 0x228   : > { %v1393_v56 = vpop.permute.xlu1 %1392  ;;  %v1398_v5 = vpop.permute.xlu0 %1397 }
 0x22c   : > { %v1403_v3 = vpop.permute.xlu1 %1402 }
 0x2f4   : > { %v1688_v1 = vpop.f32.mrb[8].mxu0 }
 0x2f5   : > { %v1721_v58 = vadd.f32 %v1688_v1, %v548_v54  ;;  %v1358_v59 = vpop.f32.mrb[9].mxu0 }
 0x2f6   : > { %v1724_v60 = vadd.f32 %v1358_v59, %v543_v55 }
 0x2f7   : > { %v1722_v62 = vadd.f32 %v1721_v58, %v1393_v56 }
 0x2f8   : > { %v1725_v0 = vadd.f32 %v1724_v60, %v1388_v57  ;;  %v1691_v46 = vpop.f32.mrb[10].mxu0 }
 0x2f9   : > { %1414 = vst [vmem:[%s403_s25 + $0x8] sm:$0xff] %v1722_v62  ;;  %v1727_v2 = vadd.f32 %v1691_v46, %v558_v61  ;;  %v1368_v47 = vpop.f32.mrb[11].mxu0 }
 0x2fa   : > { %1413 = vst [vmem:[%s403_s25] sm:$0xff] %v1725_v0  ;;  %v1730_v4 = vadd.f32 %v1368_v47, %v553_v63 }
 0x2fb   : > { %v1728_v48 = vadd.f32 %v1727_v2, %v1403_v3 }
 0x2fc   : > { %v1731_v49 = vadd.f32 %v1730_v4, %v1398_v5 }
 0x2fd   : > { %1416 = vst [vmem:[%s403_s25 + $0x18] sm:$0xff] %v1728_v48 }
 0x2fe   : > { %1415 = vst [vmem:[%s403_s25 + $0x10] sm:$0xff] %v1731_v49 }
 0x2ff   : > { %1862 = shalt.err (!%p1859_p5)
}
 0x300   : > { %s1863_s18 = scalar_lea.hbm %s2279_s17, 512  ;;  %s1867_s24 = scalar_lea.hbm %s2338_s9, 1024 }
 0x301   : > { %p1864_p6 = scmp.ne.s32.totalorder %s2279_s17, %s1863_s18  ;;  %p1868_p10 = scmp.lt.u32.totalorder %s2279_s17, %s2338_s9 }
 0x302   : > { %p1869_p11 = scmp.lt.u32.totalorder %s1867_s24, %s1863_s18  ;;  %p1871_p13 = scmp.lt.u32.totalorder %s1863_s18, %s2279_s17 }
 0x303   : > { %p1865_p7 = pnand %p1864_p6, %p2029_p4 }
 0x304   : > { %p1870_p12 = por %p1869_p11, %p1868_p10 }
 0x305   : > { %p1866_p9 = pneg %p1865_p7 }
 0x306   : > { %p1872_p0 = por %p1871_p13, %p1870_p12 }
 0x308   : > { %p1873_p1 = pnand %p1872_p0, %p1866_p9 }
 0x30a   : > { %1876 = shalt.err (!%p1873_p1)
}
 0x30b   : > { %s1937_s26 = smov 128   ;;  %s1938_s13 = smov 8  }
 0x30c   : > { %1742 = dma.vmem_to_hbm [thread:$0]  (%p2029_p4), %s2274_s27, 512, %s2279_s17, %s2283_s12, %s1937_s26, %s1937_s26, %s1938_s13  }
 0x30d PF: > { %p1749_p2 = scmp.ge.s32.totalorder %s1927_s14, 2  ;;  %s1447_s22 = sand.u32 1, %s1907_s30  }
 0x30e   : > { %s1448_s29 = scalar_lea.sflag [#allocation3], %s1447_s22 }
 0x30f   : > { %p1745_p3 = pnand %p1749_p2, %p2036_p8 }
 0x311   : > { %1902 = dma.done.wait (!%p1745_p3), %s1448_s29, 512  }
 0x312   : > { %1904 = vsyncadd (!%p1745_p3), %s1448_s29, 4294966784  ;;  %s22_s14 = sadd.s32 1, %s1927_s14   ;;  %s2350_s15 = sld [smem:[#allocation7_spill]] }
 0x313   : > { %p19_p5 = scmp.ge.s32.totalorder %s22_s14, 4   ;;  %s2351_s12 = sld [smem:[#allocation5_spill]] }
 0x314   : > { %s2352_s13 = sld [smem:[#allocation6_spill]]  ;;  %s2353_s30 = smov %s1911_s10 }
 0x315   : > { %s2354_s10 = smov %s1915_s11  ;;  %21 = sbr.rel (!%p19_p5) target bundleno = 4 (0x4), region = 101 }
 0x318   : > { %s2355_s11 = smov %s2350_s15 }
 0x31c   :  { %1453 = vsyncpa [#allocation3], 1 }
 0x31d   :  { %1455 = vsyncpa [#allocation3 + $0x1], 1 }

</bundles_post_ra>
